<compile_context>
chip_gen: v7x
topology: tpu7x:2x2x1
jax: 0.10.0
libtpu: 0.0.40
codegen_flags: <defaults>
</compile_context>

<pallas_src>
import math

import jax
import jax.numpy as jnp
from jax.experimental import pallas as pl
from jax.experimental.pallas import tpu as pltpu


# ---------------------------------------------------------------------------
# Small deterministic helper matrices (parameter / glue setup, plain JAX).
# ---------------------------------------------------------------------------
def adaptive_pool_matrix(out_size: int, in_size: int) -> jnp.ndarray:
    """Row i averages input rows [floor(i*in/out), ceil((i+1)*in/out))."""
    rows = []
    for i in range(out_size):
        start = (i * in_size) // out_size
        end = -(-((i + 1) * in_size) // out_size)  # ceil division
        inv = 1.0 / float(end - start)
        rows.append([inv if start <= h < end else 0.0 for h in range(in_size)])
    return jnp.array(rows, dtype=jnp.float32)  # (out_size, in_size)


def bilinear_matrix(out_size: int, in_size: int) -> jnp.ndarray:
    """Linear-interp matrix, align_corners=True (PyTorch F.interpolate)."""
    rows = []
    for h in range(out_size):
        row = [0.0] * in_size
        if in_size == 1:
            row[0] = 1.0
        else:
            src = 0.0 if out_size == 1 else h * (in_size - 1) / (out_size - 1)
            i0 = min(int(math.floor(src)), in_size - 1)
            i1 = min(i0 + 1, in_size - 1)
            frac = src - i0
            row[i0] += 1.0 - frac
            row[i1] += frac
        rows.append(row)
    return jnp.array(rows, dtype=jnp.float32)  # (out_size, in_size)


# ---------------------------------------------------------------------------
# Pallas kernels.
# ---------------------------------------------------------------------------
def ppm_pool_kernel(x_ref, pt_ref, w_ref, shift_ref, mask_ref, z_ref, acc_ref):
    """Fused adaptive-pool (all bins) + 1x1 conv + folded BN + ReLU.

    Grid: (N, T).  T tiles the HW axis ("arbitrary" reduction axis).
      x_ref    : (C, hw_tile)     f32   one HW tile of one batch element (NCHW)
      pt_ref   : (hw_tile, BB)    bf16  stacked pooling-matrix rows (transposed)
      w_ref    : (kR, C)          bf16  BN-scale-folded conv weights (all bins)
      shift_ref: (kR, 1)          f32   folded BN shift
      mask_ref : (kR, BB)         f32   branch(row) == branch(col) mask
      z_ref    : (kR, BB)         f32   output (written at last HW tile)
      acc_ref  : (C, BB)          f32   pooled accumulator scratch
    """
    t = pl.program_id(1)

    @pl.when(t == 0)
    def _():
        acc_ref[...] = jnp.zeros_like(acc_ref)

    # Partial adaptive-average-pool for all bins: (C, hw_tile) @ (hw_tile, BB)
    x_tile = x_ref[...].astype(jnp.bfloat16)
    acc_ref[...] += jnp.dot(x_tile, pt_ref[...],
                            preferred_element_type=jnp.float32)

    @pl.when(t == pl.num_programs(1) - 1)
    def _():
        pooled = acc_ref[...].astype(jnp.bfloat16)            # (C, BB)
        # 1x1 conv for all branches at once (BN scale already folded in W).
        full = jnp.dot(w_ref[...], pooled,
                       preferred_element_type=jnp.float32)    # (kR, BB)
        z = jnp.maximum(full + shift_ref[...], 0.0) * mask_ref[...]
        z_ref[...] = z


def ppm_upsample_kernel(z_ref, ut_ref, o_ref):
    """Bilinear upsample (align_corners=True) of all branches, one HW tile.

      z_ref : (kR, BB)        f32   fused branch activations
      ut_ref: (BB, hw_tile)   bf16  stacked upsample-weight rows (transposed)
      o_ref : (kR, hw_tile)   f32   channels-first output tile (lane dense)
    """
    z = z_ref[...].astype(jnp.bfloat16)
    o_ref[...] = jnp.dot(z, ut_ref[...], preferred_element_type=jnp.float32)


# ---------------------------------------------------------------------------
# Parameter init + one-time setup (all constant matrices hoisted here).
# ---------------------------------------------------------------------------
def init_ppm_params(key, in_dim, reduction_dim, bins):
    params = []
    for _ in bins:
        key, k_w, k_g, k_b, k_m, k_v = jax.random.split(key, 6)
        conv_w = 0.1 * jax.random.normal(k_w, (reduction_dim, in_dim), jnp.float32)
        gamma = 1.0 + 0.1 * jax.random.normal(k_g, (reduction_dim,), jnp.float32)
        beta = 0.1 * jax.random.normal(k_b, (reduction_dim,), jnp.float32)
        running_mean = 0.1 * jax.random.normal(k_m, (reduction_dim,), jnp.float32)
        running_var = 0.5 + jax.random.uniform(k_v, (reduction_dim,), jnp.float32)
        params.append(dict(conv_w=conv_w, gamma=gamma, beta=beta,
                           mean=running_mean, var=running_var))
    return params


def build_ppm_setup(params, bins, H, W, eps=1e-5):
    """Precompute stacked pool / upsample / weight / BN tensors (done once)."""
    R = params[0]["conv_w"].shape[0]
    k = len(bins)
    HW = H * W
    bb_total = sum(b * b for b in bins)
    bb_pad = -(-bb_total // 8) * 8          # pad pooled-position axis to x8

    P = jnp.zeros((bb_pad, HW), jnp.float32)      # stacked pooling rows
    U = jnp.zeros((bb_pad, HW), jnp.float32)      # stacked upsample rows (U^T)
    mask = jnp.zeros((k * R, bb_pad), jnp.float32)
    w_blocks, shift_blocks = [], []

    off = 0
    for bi, (b, p) in enumerate(zip(bins, params)):
        # Separable pool / upsample factors combined via kron (H-major, W-minor
        # flatten order matches reshape(N, C, H*W) of NCHW).
        pm = jnp.kron(adaptive_pool_matrix(b, H), adaptive_pool_matrix(b, W))  # (b*b, HW)
        um = jnp.kron(bilinear_matrix(H, b), bilinear_matrix(W, b))            # (HW, b*b)
        scale = p["gamma"] / jnp.sqrt(p["var"] + eps)                          # (R,)
        shift = p["beta"] - p["mean"] * scale                                  # (R,)

        P = P.at[off:off + b * b, :].set(pm)
        U = U.at[off:off + b * b, :].set(um.T)
        mask = mask.at[bi * R:(bi + 1) * R, off:off + b * b].set(1.0)
        w_blocks.append(p["conv_w"] * scale[:, None])                          # (R, C), BN scale folded
        shift_blocks.append(shift)
        off += b * b

    return dict(
        Pt=P.T.astype(jnp.bfloat16),                                  # (HW, BBp)
        Ut=U.astype(jnp.bfloat16),                                    # (BBp, HW)
        WfT=jnp.concatenate(w_blocks, axis=0).astype(jnp.bfloat16),   # (kR, C)
        shift=jnp.concatenate(shift_blocks, axis=0).reshape(-1, 1),   # (kR, 1) f32
        mask=mask,                                                    # (kR, BBp) f32
        bb=bb_pad, kr=k * R, H=H, W=W,
    )


def _pick_hw_tile(HW, max_tile=2048):
    """Largest multiple-of-128 divisor of HW (<= max_tile); fallback: HW."""
    best = None
    t = 128
    while t <= min(HW, max_tile):
        if HW % t == 0:
            best = t
        t += 128
    return best if best is not None else HW


# ---------------------------------------------------------------------------
# Forward wrapper.
# ---------------------------------------------------------------------------
def ppm_forward(x_nchw, setup, hw_tile=None):
    N, C, H, W = x_nchw.shape
    HW = H * W
    BB, kR = setup["bb"], setup["kr"]

    if hw_tile is None:
        hw_tile = _pick_hw_tile(HW)
    assert HW % hw_tile == 0
    T = HW // hw_tile

    # Native channels-first flatten (no transpose, no materialized bf16 copy);
    # tiles are cast to bf16 inside the kernel.
    x_flat = x_nchw.reshape(N, C, HW)

    # --- Stage 1: pool + conv + BN + ReLU (all branches fused, x read once) ---
    z = pl.pallas_call(
        ppm_pool_kernel,
        out_shape=jax.ShapeDtypeStruct((N, kR, BB), jnp.float32),
        grid_spec=pltpu.PrefetchScalarGridSpec(
            num_scalar_prefetch=0,
            grid=(N, T),
            in_specs=[
                pl.BlockSpec((pl.Squeezed(), C, hw_tile), lambda n, t: (n, 0, t)),  # x
                pl.BlockSpec((hw_tile, BB), lambda n, t: (t, 0)),                   # P^T
                pl.BlockSpec((kR, C), lambda n, t: (0, 0)),                         # Wf^T
                pl.BlockSpec((kR, 1), lambda n, t: (0, 0)),                         # shift
                pl.BlockSpec((kR, BB), lambda n, t: (0, 0)),                        # mask
            ],
            out_specs=pl.BlockSpec((pl.Squeezed(), kR, BB), lambda n, t: (n, 0, 0)),
            scratch_shapes=[pltpu.VMEM((C, BB), jnp.float32)],
        ),
        compiler_params=pltpu.CompilerParams(
            dimension_semantics=("parallel", "arbitrary")),
    )(x_flat, setup["Pt"], setup["WfT"], setup["shift"], setup["mask"])

    # --- Stage 2: bilinear upsample of all branches, channels-first output ---
    y = pl.pallas_call(
        ppm_upsample_kernel,
        out_shape=jax.ShapeDtypeStruct((N, kR, HW), jnp.float32),
        grid_spec=pltpu.PrefetchScalarGridSpec(
            num_scalar_prefetch=0,
            grid=(N, T),
            in_specs=[
                pl.BlockSpec((pl.Squeezed(), kR, BB), lambda n, t: (n, 0, 0)),   # Z
                pl.BlockSpec((BB, hw_tile), lambda n, t: (0, t)),                # U^T
            ],
            out_specs=pl.BlockSpec((pl.Squeezed(), kR, hw_tile), lambda n, t: (n, 0, t)),
        ),
        compiler_params=pltpu.CompilerParams(
            dimension_semantics=("parallel", "parallel")),
    )(z, setup["Ut"])

    # Channels-first already: just reshape (free) + single concat with x.
    branches = y.reshape(N, kR, H, W)
    return jnp.concatenate([x_nchw, branches], axis=1)


# ---------------------------------------------------------------------------
# Pure-JAX f32 reference (per-branch, PyTorch-equivalent math).
# ---------------------------------------------------------------------------
def ppm_forward_reference(x_nchw, params, bins, eps=1e-5):
    N, C, H, W = x_nchw.shape
    x_flat = jnp.transpose(x_nchw, (0, 2, 3, 1)).reshape(N, H * W, C)
    outs = [x_nchw]
    for bin_size, p in zip(bins, params):
        pool_mat = jnp.kron(adaptive_pool_matrix(bin_size, H),
                            adaptive_pool_matrix(bin_size, W))
        up_mat = jnp.kron(bilinear_matrix(H, bin_size),
                          bilinear_matrix(W, bin_size))
        scale = p["gamma"] / jnp.sqrt(p["var"] + eps)
        shift = p["beta"] - p["mean"] * scale
        pooled = jnp.einsum("ps,nsc->npc", pool_mat, x_flat)
        z = jnp.einsum("npc,cr->npr", pooled, p["conv_w"].T)
        z = jnp.maximum(z * scale[None, None, :] + shift[None, None, :], 0.0)
        up = jnp.einsum("sp,npr->nsr", up_mat, z)
        R = up.shape[-1]
        outs.append(jnp.transpose(up.reshape(N, H, W, R), (0, 3, 1, 2)))
    return jnp.concatenate(outs, axis=1)


if __name__ == "__main__":
    # Small deterministic config consistent with the module
    N, C_in, H, W = 2, 4, 16, 16
    reduction_dim = 2
    bins = (1, 2, 3, 6)

    key = jax.random.PRNGKey(0)
    key, kx = jax.random.split(key)
    x = jax.random.normal(kx, (N, C_in, H, W), jnp.float32)

    params = init_ppm_params(key, C_in, reduction_dim, bins)
    setup = build_ppm_setup(params, bins, H, W)

    # hw_tile=128 -> 2 HW tiles, exercising the tiled reduction path.
    out = ppm_forward(x, setup, hw_tile=128)
    out = jax.block_until_ready(out)

    expected_channels = C_in + len(bins) * reduction_dim
    assert out.shape == (N, expected_channels, H, W), out.shape

    ref = ppm_forward_reference(x, params, bins)
    max_err = float(jnp.max(jnp.abs(out - ref)))
    # bf16 matmul operands -> loosened tolerance vs. the f32 reference.
    assert jnp.allclose(out, ref, atol=3e-2, rtol=3e-2), max_err

    print("KERNEL_OK")
</pallas_src>

<mosaic_0001>
module attributes {stable_mosaic.version = 11 : i64} {
  func.func @ppm_pool_kernel(%arg0: i32, %arg1: i32, %arg2: memref<1x4x128xf32, #tpu.memory_space<vmem>>, %arg3: memref<128x56xbf16, #tpu.memory_space<vmem>>, %arg4: memref<8x4xbf16, #tpu.memory_space<vmem>>, %arg5: memref<8x1xf32, #tpu.memory_space<vmem>>, %arg6: memref<8x56xf32, #tpu.memory_space<vmem>>, %arg7: memref<1x8x56xf32, #tpu.memory_space<vmem>>, %arg8: memref<4x56xf32, #tpu.memory_space<vmem>>) attributes {dimension_semantics = [#tpu.dimension_semantics<parallel>, #tpu.dimension_semantics<arbitrary>], iteration_bounds = array<i64: 2, 2>, scalar_prefetch = 0 : i64, scratch_operands = 1 : i64, tpu.core_type = #tpu.core_type<tc>, window_params = [{transform_indices = @transform_0, window_bounds = array<i64: 1, 4, 128>}, {transform_indices = @transform_1, window_bounds = array<i64: 128, 56>}, {pipeline_mode = #tpu.pipeline_mode<synchronous>, transform_indices = @transform_2, window_bounds = array<i64: 8, 4>}, {pipeline_mode = #tpu.pipeline_mode<synchronous>, transform_indices = @transform_3, window_bounds = array<i64: 8, 1>}, {pipeline_mode = #tpu.pipeline_mode<synchronous>, transform_indices = @transform_4, window_bounds = array<i64: 8, 56>}, {transform_indices = @transform_5, window_bounds = array<i64: 1, 8, 56>}]} {
    %c0_i32 = arith.constant 0 : i32
    %0 = arith.cmpi eq, %arg1, %c0_i32 : i32
    %1 = arith.extui %0 : i1 to i32
    %c0_i32_0 = arith.constant 0 : i32
    %2 = arith.cmpi ne, %1, %c0_i32_0 : i32
    scf.if %2 {
      %cst_10 = arith.constant 0.000000e+00 : f32
      %14 = vector.broadcast %cst_10 : f32 to vector<4x56xf32>
      %c0_11 = arith.constant 0 : index
      %c0_12 = arith.constant 0 : index
      %15 = vector.load %arg8[%c0_11, %c0_12] : memref<4x56xf32, #tpu.memory_space<vmem>>, vector<4x56xf32>
      tpu.vector_store %arg8[%c0_11, %c0_12], %14 {strides = array<i32>} : memref<4x56xf32, #tpu.memory_space<vmem>>, vector<4x56xf32>,
    } else {
    }
    %c0 = arith.constant 0 : index
    %c0_1 = arith.constant 0 : index
    %c0_2 = arith.constant 0 : index
    %3 = vector.load %arg2[%c0, %c0_1, %c0_2] : memref<1x4x128xf32, #tpu.memory_space<vmem>>, vector<1x4x128xf32>
    %4 = vector.shape_cast %3 : vector<1x4x128xf32> to vector<4x128xf32>
    %5 = arith.truncf %4 : vector<4x128xf32> to vector<4x128xbf16>
    %c0_3 = arith.constant 0 : index
    %c0_4 = arith.constant 0 : index
    %6 = vector.load %arg8[%c0_3, %c0_4] : memref<4x56xf32, #tpu.memory_space<vmem>>, vector<4x56xf32>
    %c0_5 = arith.constant 0 : index
    %c0_6 = arith.constant 0 : index
    %7 = vector.load %arg3[%c0_5, %c0_6] : memref<128x56xbf16, #tpu.memory_space<vmem>>, vector<128x56xbf16>
    %cst = arith.constant dense<0.000000e+00> : vector<4x56xf32>
    %8 = tpu.matmul %5, %7, %cst {dimension_numbers = #tpu.dot_dimension_numbers<[1], [0], [0], [1], [0, 0, 1, 1], [], []>} : vector<4x128xbf16>, vector<128x56xbf16>, vector<4x56xf32> -> vector<4x56xf32>
    %9 = arith.addf %6, %8 : vector<4x56xf32>
    %c0_7 = arith.constant 0 : index
    %c0_8 = arith.constant 0 : index
    %10 = vector.load %arg8[%c0_7, %c0_8] : memref<4x56xf32, #tpu.memory_space<vmem>>, vector<4x56xf32>
    tpu.vector_store %arg8[%c0_7, %c0_8], %9 {strides = array<i32>} : memref<4x56xf32, #tpu.memory_space<vmem>>, vector<4x56xf32>,
    %c1_i32 = arith.constant 1 : i32
    %11 = arith.cmpi eq, %arg1, %c1_i32 : i32
    %12 = arith.extui %11 : i1 to i32
    %c0_i32_9 = arith.constant 0 : i32
    %13 = arith.cmpi ne, %12, %c0_i32_9 : i32
    scf.if %13 {
      %c0_10 = arith.constant 0 : index
      %c0_11 = arith.constant 0 : index
      %14 = vector.load %arg8[%c0_10, %c0_11] : memref<4x56xf32, #tpu.memory_space<vmem>>, vector<4x56xf32>
      %15 = arith.truncf %14 : vector<4x56xf32> to vector<4x56xbf16>
      %c0_12 = arith.constant 0 : index
      %c0_13 = arith.constant 0 : index
      %16 = vector.load %arg4[%c0_12, %c0_13] : memref<8x4xbf16, #tpu.memory_space<vmem>>, vector<8x4xbf16>
      %cst_14 = arith.constant dense<0.000000e+00> : vector<8x56xf32>
      %17 = tpu.matmul %16, %15, %cst_14 {dimension_numbers = #tpu.dot_dimension_numbers<[1], [0], [0], [1], [0, 0, 1, 1], [], []>} : vector<8x4xbf16>, vector<4x56xbf16>, vector<8x56xf32> -> vector<8x56xf32>
      %c0_15 = arith.constant 0 : index
      %c0_16 = arith.constant 0 : index
      %18 = vector.load %arg5[%c0_15, %c0_16] : memref<8x1xf32, #tpu.memory_space<vmem>>, vector<8x1xf32>
      %19 = vector.broadcast %18 : vector<8x1xf32> to vector<8x56xf32>
      %20 = arith.addf %17, %19 : vector<8x56xf32>
      %cst_17 = arith.constant 0.000000e+00 : f32
      %21 = vector.broadcast %cst_17 : f32 to vector<8x56xf32>
      %22 = arith.maximumf %20, %21 : vector<8x56xf32>
      %c0_18 = arith.constant 0 : index
      %c0_19 = arith.constant 0 : index
      %23 = vector.load %arg6[%c0_18, %c0_19] : memref<8x56xf32, #tpu.memory_space<vmem>>, vector<8x56xf32>
      %24 = arith.mulf %22, %23 : vector<8x56xf32>
      %c0_20 = arith.constant 0 : index
      %c0_21 = arith.constant 0 : index
      %c0_22 = arith.constant 0 : index
      %25 = vector.load %arg7[%c0_20, %c0_21, %c0_22] : memref<1x8x56xf32, #tpu.memory_space<vmem>>, vector<1x8x56xf32>
      %26 = vector.shape_cast %25 : vector<1x8x56xf32> to vector<8x56xf32>
      %27 = vector.shape_cast %24 : vector<8x56xf32> to vector<1x8x56xf32>
      tpu.vector_store %arg7[%c0_20, %c0_21, %c0_22], %27 {strides = array<i32>} : memref<1x8x56xf32, #tpu.memory_space<vmem>>, vector<1x8x56xf32>,
    } else {
    }
    return
  }
  func.func @transform_0(%arg0: i32, %arg1: i32) -> (i32, i32, i32) {
    %c0_i32 = arith.constant 0 : i32
    %c0_i32_0 = arith.constant 0 : i32
    return %arg0, %c0_i32, %arg1 : i32, i32, i32
  }
  func.func @transform_1(%arg0: i32, %arg1: i32) -> (i32, i32) {
    %c0_i32 = arith.constant 0 : i32
    %c0_i32_0 = arith.constant 0 : i32
    return %arg1, %c0_i32 : i32, i32
  }
  func.func @transform_2(%arg0: i32, %arg1: i32) -> (i32, i32) {
    %c0_i32 = arith.constant 0 : i32
    %c0_i32_0 = arith.constant 0 : i32
    %c0_i32_1 = arith.constant 0 : i32
    return %c0_i32, %c0_i32_0 : i32, i32
  }
  func.func @transform_3(%arg0: i32, %arg1: i32) -> (i32, i32) {
    %c0_i32 = arith.constant 0 : i32
    %c0_i32_0 = arith.constant 0 : i32
    %c0_i32_1 = arith.constant 0 : i32
    return %c0_i32, %c0_i32_0 : i32, i32
  }
  func.func @transform_4(%arg0: i32, %arg1: i32) -> (i32, i32) {
    %c0_i32 = arith.constant 0 : i32
    %c0_i32_0 = arith.constant 0 : i32
    %c0_i32_1 = arith.constant 0 : i32
    return %c0_i32, %c0_i32_0 : i32, i32
  }
  func.func @transform_5(%arg0: i32, %arg1: i32) -> (i32, i32, i32) {
    %c0_i32 = arith.constant 0 : i32
    %c0_i32_0 = arith.constant 0 : i32
    %c0_i32_1 = arith.constant 0 : i32
    return %arg0, %c0_i32, %c0_i32_0 : i32, i32, i32
  }
}

</mosaic_0001>

<bundles_post_ra>
// kernel: tpu_custom_call.1
= control target key start
LH: loop header
LB: loop body
LE: loop exit
PB: predicated region body
PF: predicated region fallthrough
CT: control target
= control target key end

     0   :  { %10 = vsyncpa [#allocation4], 0  ;;  %s1001_s0 = inlined_call_operand.vmem [shape: f32[2,4,256], index: 0, kind: input, shape index: {}]   ;;  %s1002_s1 = inlined_call_operand.vmem [shape: bf16[256,56], index: 1, kind: input, shape index: {}]   ;;  %s1003_s2 = inlined_call_operand.vmem [shape: bf16[8,4], index: 2, kind: input, shape index: {}]   ;;  %s1004_s3 = inlined_call_operand.vmem [shape: f32[8,1], index: 3, kind: input, shape index: {}]   ;;  %s1005_s4 = inlined_call_operand.vmem [shape: f32[8,56], index: 4, kind: input, shape index: {}]   ;;  %s1006_s5 = inlined_call_operand.hbm [shape: f32[2,8,56], index: 5, kind: output, shape index: {}]  }
   0x1   :  { %12 = vsyncpa [#allocation4 + $0x1], 0  ;;  %s834_s18 = smov 0   ;;  %s836_s19 = smov 0  }
   0x2   :  { %s838_s20 = smov 0   ;;  %s840_s21 = smov 0  }
   0x3   :  { %s842_s22 = smov 0   ;;  %s844_s23 = smov 0  }
   0x4   :  { %s846_s24 = smov 0   ;;  %s848_s25 = smov 0  }
   0x5 LB: > { %1010 = sst [smem:[#allocation6_spill]] %s791_s24  ;;  %s553_s26 = sadd.s32 4294967295, %s795_s25   ;;  %s795_s25 = sphi %s848_s25, %s18_s25   ;;  %s791_s24 = sphi %s846_s24, %s1018_s24   ;;  %s787_s23 = sphi %s844_s23, %s1023_s23   ;;  %s783_s22 = sphi %s842_s22, %s1016_s22   ;;  %s779_s21 = sphi %s840_s21, %s1022_s21   ;;  %s775_s20 = sphi %s838_s20, %s1021_s20   ;;  %s771_s19 = sphi %s836_s19, %s1020_s19   ;;  %s767_s18 = sphi %s834_s18, %s1019_s18  }
   0x6   : > { %s554_s27 = sadd.s32 4294967294, %s795_s25   ;;  %s27_s28 = sadd.s32 1, %s787_s23 }
   0x7   : > { %p28_p0 = scmp.ge.s32.totalorder %s27_s28, 2  ;;  %s30_s29 = sadd.s32 1, %s791_s24 }
   0x8   : > { %p164_p1 = scmp.ne.s32.totalorder %s775_s20, %s771_s19  ;;  %p165_p2 = scmp.eq.s32.totalorder %s553_s26, 3 }
   0x9   : > { %s1025_s28 = smov (%p28_p0, %s27_s28), 0  ;;  %s1027_s29 = smov (!%p28_p0, %s30_s29), %s791_s24 }
   0xa   : > { %1011 = sst [smem:[#allocation7_spill]] %s1025_s28  ;;  %p883_p3 = por %p165_p2, %p164_p1 }
   0xb   : > { %p170_p4 = scmp.ne.s32.totalorder %s771_s19, %s767_s18  ;;  %p32_p5 = scmp.ge.s32.totalorder %s1027_s29, 2 }
   0xc   : > { %p171_p6 = scmp.eq.s32.totalorder %s554_s27, 3  ;;  %p557_p7 = scmp.ge.s32.totalorder %s795_s25, 1 }
   0xd   : > { %p218_p8 = scmp.lt.s32.totalorder %s795_s25, 5  ;;  %s1029_s29 = smov (%p32_p5, %s1027_s29), 0 }
   0xe   : > { %1013 = sst [smem:[#allocation8_spill]] %s1029_s29  ;;  %p893_p9 = por %p171_p6, %p170_p4 }
   0xf   : > { %p219_p10 = pnand %p557_p7, %p218_p8  ;;  %s151_s7 = ssub.s32 %s791_s24, %s1029_s29 }
  0x10   : > { %s154_s8 = sadd.s32 1, %s775_s20  ;;  %p152_p11 = scmp.eq.s32.totalorder %s151_s7, 0 }
  0x11   : > { %222 = sbr.rel (%p219_p10) target bundleno = 541 (0x21d), region = 40  ;;  %s1008_s10 = sand.u32 (!%p219_p10), 1, %s771_s19  }
  0x12   : > { %s901_s9 = scalar_select %p152_p11, %s775_s20, %s154_s8  }
  0x13   : > { %p254_p12 = scmp.lt.s32.totalorder (!%p219_p10), %s783_s22, 1  ;;  %s907_s11 = sshll.u32 (!%p219_p10), %s1008_s10, 3 }
  0x14   : > { %p256_p13 = scmp.lt.s32.totalorder (!%p219_p10), %s779_s21, 1  ;;  %s561_s12 = sshll.u32 (!%p219_p10), %s779_s21, 4 }
  0x15   : > { %p263_p0 = scmp.lt.s32.totalorder (!%p219_p10), %s561_s12, 31  ;;  %s253_s24 = scalar_lea.vmem (!%p219_p10), [#allocation3], %s907_s11 }
  0x16   : > { %p563_p1 = scmp.ne.s32.totalorder (!%p219_p10), %s779_s21, 0 }
  0x18   : > { %s255_s13 = scalar_select %p254_p12, %s783_s22, 1 }
  0x19   : > { %s257_s14 = scalar_select %p256_p13, %s779_s21, 1 }
  0x1a   : > { %s559_s15 = sshll.u32 %s255_s13, 1  ;;  %s1031_s12 = smov (!%p263_p0, %s561_s12), 31  ;;  %vm273_vm0 = vcmask (!%p563_p1), 453632   ;;  %v797_v0 = vmov (!%p563_p1), 0.0  }
  0x1b   : > { %s259_s16 = sadd.s32 %s559_s15, %s257_s14  ;;  %s562_s8 = sshll.u32 %s1031_s12, 2  ;;  %274 = vst.msk [vmem:[#allocation2] sm:$0xf] (!%p563_p1), %vm273_vm0, %v797_v0 }
  0x1c   : > { %s560_s17 = sshll.u32 %s259_s16, 2  ;;  %s921_s10 = scalar_lea.vmem %s1002_s1, %s562_s8 }
  0x1d   : > { %s916_s7 = scalar_lea.vmem %s1001_s0, %s560_s17  ;;  %272 = sbr.rel (%p563_p1) target bundleno = 36 (0x24), region = 44 }
  0x24 PF: > { %v692_v1 = vld [vmem:[%s921_s10] sm:$0xff]   ;;  %v798_v2 = vmov 0.0   ;;  %v693_v3 = vld [vmem:[%s921_s10 + $0x8] sm:$0xff]   ;;  %vm799_vm1 = vmmov 0   ;;  %v694_v4 = vld [vmem:[%s921_s10 + $0x10] sm:$0xff]   ;;  %vm383_vm2 = vcmask 453632  }
  0x25   : > { %589 = vmatprep.subr.bf16.mxu0 %v798_v2  ;;  %605 = vmatprep.mubr.msk.bf16.mxu0 %vm799_vm1, %v798_v2  ;;  %v695_v5 = vld [vmem:[%s921_s10 + $0x18] sm:$0xff]   ;;  %v696_v6 = vld [vmem:[%s921_s10 + $0x20] sm:$0xff]   ;;  %v697_v7 = vld [vmem:[%s921_s10 + $0x28] sm:$0xff]   ;;  %p572_p2 = scmp.ne.s32.totalorder %s779_s21, 1 }
  0x26   : > { %590 = vmatpush3.bf16.msra.mxu0 %v692_v1  ;;  %v698_v8 = vld [vmem:[%s921_s10 + $0x30] sm:$0xff]   ;;  %v699_v9 = vld [vmem:[%s921_s10 + $0x38] sm:$0xff]   ;;  %v275_v10 = vld [vmem:[%s916_s7] sm:$0xf]  ;;  %vm402_vm3 = vcmask (!%p572_p2), 1041408   ;;  %v800_v19 = vmov (!%p572_p2), 0.0  }
  0x27   : > { %591 = vmatprep.subr.bf16.mxu0 %v798_v2  ;;  %v276_v11 = vpack.c.bf16 %v275_v10, %v275_v10  ;;  %v277_v12 = vld [vmem:[#allocation2] sm:$0xf]  ;;  %vm801_vm4 = vmmov (!%p572_p2), 0   ;;  %v802_v22 = vmov (!%p572_p2), 0   ;;  %vm398_vm5 = vcmask (!%p572_p2), 31744  }
  0x28   : > { %v392_v21 = vld [vmem:[%s1004_s3] sm:$0xff] (!%p572_p2)  ;;  %700 = vset.pattern.permute.xlu0 (!%p572_p2), %v802_v22  ;;  %vm449_vm6 = vcmask (!%p572_p2), 457728  }
  0x29   : > { %395 = vperm.xlu0 (!%p572_p2), %700, %v392_v21   ;;  %v391_v24 = vld [vmem:[%s1003_s2] sm:$0xf] (!%p572_p2) }
  0x2a   : > { %592 = vmatpush3.bf16.msra.mxu0 %v693_v3  ;;  %v447_v29 = vld [vmem:[%s1005_s4] sm:$0xff] (!%p572_p2) }
  0x2b   : > { %593 = vmatprep.subr.bf16.mxu0 %v798_v2 }
  0x2e   : > { %594 = vmatpush3.bf16.msra.mxu0 %v694_v4 }
  0x2f   : > { %595 = vmatprep.subr.bf16.mxu0 %v798_v2 }
  0x32   : > { %596 = vmatpush3.bf16.msra.mxu0 %v695_v5 }
  0x33   : > { %597 = vmatprep.subr.bf16.mxu0 %v798_v2 }
  0x36   : > { %598 = vmatpush3.bf16.msra.mxu0 %v696_v6 }
  0x37   : > { %599 = vmatprep.subr.bf16.mxu0 %v798_v2 }
  0x3a   : > { %600 = vmatpush3.bf16.msra.mxu0 %v697_v7 }
  0x3b   : > { %601 = vmatprep.subr.bf16.mxu0 %v798_v2 }
  0x3e   : > { %602 = vmatpush3.bf16.msra.mxu0 %v698_v8 }
  0x3f   : > { %603 = vmatprep.subr.bf16.mxu0 %v798_v2 }
  0x42   : > { %604 = vmatpush3.bf16.msra.mxu0 %v699_v9 }
  0x43   : > { %609 = vmatprep.subr.bf16.mxu0 (!%p572_p2), %v800_v19 }
  0x45   : > { %606 = vmatmul.mubr.bf16.vlgmr.msra.gmra.mrb[0].mxu0 %v276_v11 }
  0x46   : > { %611 = vmatprep.mubr.msk.bf16.mxu0 (!%p572_p2), %vm801_vm4, %v800_v19 }
  0xa8   : > { %v396_v25 = vpop.permute.xlu0 (!%p572_p2), %395 }
 0x115   : > { %388 = sbr.rel (%p572_p2) target bundleno = 516 (0x204), region = 48 }
 0x118   : > { %v376_v13 = vpop.f32.mrb[0].mxu0 }
 0x119   : > { %v382_v14 = vadd.f32 %v376_v13, %v277_v12  ;;  %v607_v15 = vpop.f32.mrb[1].mxu0 }
 0x11a   : > { %v379_v16 = vpop.f32.mrb[2].mxu0 }
 0x11b   : > { %384 = vst.msk [vmem:[#allocation2] sm:$0xf] %vm383_vm2, %v382_v14  ;;  %v608_v17 = vpop.f32.mrb[3].mxu0 }
 0x122   : > { %v389_v18 = vld [vmem:[#allocation2] sm:$0xf] }
 0x123   : > { %v390_v20 = vpack.c.bf16 %v389_v18, %v389_v18 }
 0x125   : > { %v404_v23 = vsel %vm402_vm3, %v390_v20, 0 }
 0x126   : > { %610 = vmatpush3.bf16.msra.mxu0 %v404_v23 }
 0x129   : > { %612 = vmatmul.mubr.msk.bf16.vlgmr.msra.gmra.mrb[0].mxu0 %vm398_vm5, %v391_v24 }
 0x1fc   : > { %v440_v26 = vpop.f32.mrb[0].mxu0 }
 0x1fd   : > { %v441_v27 = vadd.f32 %v440_v26, %v396_v25  ;;  %v613_v28 = vpop.f32.mrb[1].mxu0 }
 0x1fe   : > { %v443_v30 = vpop.f32.mrb[2].mxu0 }
 0x1ff   : > { %v446_v31 = vmax.f32 %v441_v27, 0.0  ;;  %v614_v32 = vpop.f32.mrb[3].mxu0 }
 0x201   : > { %v448_v33 = vmul.f32 %v447_v29, %v446_v31 }
 0x203   : > { %450 = vst.msk [vmem:[%s253_s24] sm:$0xff] %vm449_vm6, %v448_v33 }
 0x204 PF: > { %s575_s14 = sshll.u32 %s783_s22, 7  ;;  %s465_s26 = sshll.u32 %s253_s24, 4  ;;  %s466_s26 = int_to_ptr.vmem [resolvable:$true] %s465_s26 }
 0x205   : > { %s950_s17 = scalar_lea.hbm %s1006_s5, %s575_s14  ;;  %s1015_s27 = sand.u32 1, %s771_s19  }
 0x206   : > { %s452_s7 = scalar_lea.sflag [#allocation4], %s1015_s27  ;;  %s701_s8 = scalar_lea.vmem %s466_s26, 128 }
 0x207   : > { %p702_p4 = scmp.ne.s32.totalorder %s466_s26, %s701_s8  ;;  %s803_s28 = smov [#allocation3]  }
 0x208   : > { %s705_s29 = sshll.u32 %s803_s28, 4  ;;  %s706_s29 = int_to_ptr.vmem [resolvable:$false] %s705_s29 }
 0x209   : > { %p703_p5 = pnand %p702_p4, %p883_p3  ;;  %s707_s10 = scalar_lea.vmem %s706_s29, 256 }
 0x20a   : > { %p708_p7 = scmp.lt.s32.totalorder %s466_s26, %s706_s29  ;;  %p709_p8 = scmp.lt.s32.totalorder %s707_s10, %s701_s8 }
 0x20b   : > { %p704_p6 = pneg %p703_p5 }
 0x20c   : > { %p710_p10 = por %p709_p8, %p708_p7 }
 0x20e   : > { %p711_p11 = pnand %p710_p10, %p704_p6 }
 0x210   : > { %714 = shalt.err (!%p711_p11)
}
 0x211   : > { %s715_s22 = scalar_lea.hbm %s950_s17, 128  ;;  %s719_s21 = scalar_lea.hbm %s1006_s5, 256 }
 0x212   : > { %p716_p12 = scmp.ne.s32.totalorder %s950_s17, %s715_s22  ;;  %p720_p1 = scmp.lt.u32.totalorder %s950_s17, %s1006_s5 }
 0x213   : > { %p721_p2 = scmp.lt.u32.totalorder %s719_s21, %s715_s22  ;;  %p723_p5 = scmp.lt.u32.totalorder %s715_s22, %s950_s17 }
 0x214   : > { %p717_p13 = pnand %p716_p12, %p883_p3 }
 0x215   : > { %p722_p4 = por %p721_p2, %p720_p1 }
 0x216   : > { %p718_p0 = pneg %p717_p13 }
 0x217   : > { %p724_p6 = por %p723_p5, %p722_p4 }
 0x219   : > { %p725_p7 = pnand %p724_p6, %p718_p0 }
 0x21b   : > { %728 = shalt.err (!%p725_p7)
}
 0x21c   : > { %615 = dma.vmem_to_hbm [thread:$0]  (%p883_p3), %s466_s26, 128, %s950_s17, %s452_s7  }
 0x21d PF: > { %p621_p8 = scmp.ge.s32.totalorder %s795_s25, 2  ;;  %s477_s14 = sand.u32 1, %s767_s18  }
 0x21e   : > { %s478_s15 = scalar_lea.sflag [#allocation4], %s477_s14 }
 0x21f   : > { %p618_p10 = pnand %p621_p8, %p893_p9 }
 0x221   : > { %762 = dma.done.wait (!%p618_p10), %s478_s15, 128  }
 0x222   : > { %764 = vsyncadd (!%p618_p10), %s478_s15, 4294967168  ;;  %s18_s25 = sadd.s32 1, %s795_s25   ;;  %s1016_s22 = sld [smem:[#allocation6_spill]] }
 0x223   : > { %p15_p11 = scmp.ge.s32.totalorder %s18_s25, 6   ;;  %s1017_s30 = sld [smem:[#allocation7_spill]] }
 0x224   : > { %s1018_s24 = sld [smem:[#allocation8_spill]]  ;;  %s1019_s18 = smov %s771_s19 }
 0x225   : > { %s1020_s19 = smov %s775_s20  ;;  %s1021_s20 = smov %s901_s9 }
 0x226   : > { %s1022_s21 = smov %s787_s23  ;;  %17 = sbr.rel (!%p15_p11) target bundleno = 5 (0x5), region = 86 }
 0x229   : > { %s1023_s23 = smov %s1017_s30 }
 0x22d   :  { %483 = vsyncpa [#allocation4], 1 }
 0x22e   :  { %485 = vsyncpa [#allocation4 + $0x1], 1 }

</bundles_post_ra>
